<compile_context>
chip_gen: v7x
topology: tpu7x:2x2x1
jax: 0.10.0
libtpu: 0.0.40
codegen_flags: <defaults>
</compile_context>

<pallas_src>
import jax
import jax.numpy as jnp
from jax.experimental import pallas as pl
from jax.experimental.pallas import tpu as pltpu


def _round_up(x, m):
    return ((x + m - 1) // m) * m


def _vmem_capacity_bytes():
    try:
        return int(pltpu.get_tpu_info().vmem_capacity_bytes)
    except Exception:
        return 64 * 1024 * 1024  # conservative fallback (v7x per-TC VMEM)


def _choose_tiles(N, M, D, in_itemsize, out_itemsize, vmem_budget,
                  tn_max=1024, tm_max=1024):
    """Largest (tn, tm) whose double-buffered footprint fits vmem_budget.
    Shrinks tn (sublane dim) first so tm (the output lane dim) stays as
    large / lane-dense as possible."""
    tn = min(tn_max, _round_up(N, 8))        # sublane-aligned
    tm = min(tm_max, _round_up(M, 128))      # lane-aligned (unmasked stores)

    def footprint(a, b):
        ins = 2 * (a * D + D * b) * in_itemsize   # X / Z^T tiles, double-buffered
        norms = 2 * (a + b) * 4                   # norm tiles, double-buffered
        outs = 2 * a * b * out_itemsize           # output tile, double-buffered
        scratch = a * b * 4                       # f32 intermediates margin
        return ins + norms + outs + scratch

    while footprint(tn, tm) > vmem_budget:
        if tn > 256:
            tn = max(256, _round_up(tn // 2, 8))
        elif tm > 128:
            tm = max(128, _round_up(tm // 2, 128))
        elif tn > 8:
            tn = max(8, _round_up(tn // 2, 8))
        else:
            break
    return tn, tm


def _ensure_two_programs(N, M, tn, tm):
    """If the whole problem fits in one tile, split the sublane axis so a
    v7x chip can shard >=2 programs across its two TensorCores (keeps tm
    lane-dense)."""
    if pl.cdiv(N, tn) * pl.cdiv(M, tm) >= 2:
        return tn, tm
    if N > 8:
        tn = min(tn, max(8, _round_up((N + 1) // 2, 8)))
    elif M > 128:
        tm = min(tm, max(128, _round_up((M + 1) // 2, 128)))
    return tn, tm


def _rbf_kernel(params_ref, x_ref, zt_ref, x2_ref, z2_ref, o_ref):
    # params_ref: SMEM (2,) -> [sigma^2, 1/lengthscale^2]    (scalar prefetch)
    # x_ref:  VMEM (tn, D)      zt_ref: VMEM (D, tm)   (Z pre-transposed)
    # x2_ref: VMEM (tn, 1)      z2_ref: VMEM (1, tm)   (row norms * -0.5/l^2, f32)
    # o_ref:  VMEM (tn, tm)
    sigma2 = params_ref[0]
    inv_l2 = params_ref[1]

    # Cross term on the MXU: plain (tn, D) x (D, tm) matmul, no transpose.
    xz = jnp.dot(x_ref[...], zt_ref[...], preferred_element_type=jnp.float32)

    # exponent = -0.5 * ||x - z||^2 / l^2  (scales folded into inputs/params)
    expo = inv_l2 * xz + x2_ref[...] + z2_ref[...]
    expo = jnp.minimum(expo, 0.0)            # exponent-domain clamp: K <= sigma^2
    o_ref[...] = (sigma2 * jnp.exp(expo)).astype(o_ref.dtype)


def batched_rbf_forward(X, Z, sigma=1.0, lengthscale=2.0, diag=False,
                        tn=None, tm=None, out_dtype=jnp.float32):
    """Pallas implementation of batched_RBF.forward.

    Note: with bfloat16 inputs, the ||x||^2+||z||^2-2x.z expansion loses some
    precision for nearly identical points; use looser tolerances (or f32 in)
    when comparing against a direct-diff reference. out_dtype=jnp.bfloat16 is
    the fast path (halves the dominant HBM output write stream).
    """
    sigma2 = jnp.asarray(sigma, jnp.float32) ** 2
    if diag:
        # Trivial broadcast of sigma^2 to (1, *X.shape) -- no hot path, plain JAX.
        return jnp.broadcast_to(sigma2, (1,) + X.shape)

    N = X.shape[0]
    M = Z.shape[0]
    # covariance() sums the squared diff over all trailing dims -> flatten.
    # Keep the input dtype (e.g. bf16 stays bf16 for DMA + MXU).
    Xf = jnp.reshape(X, (N, -1))
    Zf = jnp.reshape(Z, (M, -1))
    D = Xf.shape[1]
    assert Zf.shape[1] == D, "X and Z must have matching feature dims"

    inv_l2 = 1.0 / (jnp.asarray(lengthscale, jnp.float32) ** 2)
    # Row norms hoisted out of the kernel, prescaled by -0.5/l^2, always f32.
    X2 = -0.5 * inv_l2 * jnp.sum(Xf.astype(jnp.float32) ** 2, axis=1,
                                 keepdims=True)                      # (N, 1)
    Z2 = -0.5 * inv_l2 * jnp.sum(Zf.astype(jnp.float32) ** 2, axis=1)[None, :]  # (1, M)
    # One-time transpose (amortized over all row tiles of X) so the in-kernel
    # contraction needs no per-tile transpose / vxpose.
    Zt = Zf.T                                                        # (D, M)

    in_itemsize = jnp.dtype(Xf.dtype).itemsize
    out_itemsize = jnp.dtype(out_dtype).itemsize

    # Generation-aware VMEM limit / tile budget.
    vmem_cap = _vmem_capacity_bytes()
    vmem_limit = int(min(vmem_cap // 2, 64 * 1024 * 1024))   # 64 MiB v5e/v6e, 32 MiB v7x
    vmem_budget = (vmem_limit * 3) // 4                      # margin for Mosaic scratch

    tn_auto, tm_auto = _choose_tiles(N, M, D, in_itemsize, out_itemsize, vmem_budget)
    tn = tn if tn is not None else tn_auto
    tm = tm if tm is not None else tm_auto
    tn, tm = _ensure_two_programs(N, M, tn, tm)

    # Pad to tile multiples; padded rows/cols are sliced off afterwards.
    Np = _round_up(N, tn)
    Mp = _round_up(M, tm)
    if Np != N:
        Xf = jnp.pad(Xf, ((0, Np - N), (0, 0)))
        X2 = jnp.pad(X2, ((0, Np - N), (0, 0)))
    if Mp != M:
        Zt = jnp.pad(Zt, ((0, 0), (0, Mp - M)))
        Z2 = jnp.pad(Z2, ((0, 0), (0, Mp - M)))

    params = jnp.stack([sigma2, inv_l2])     # (2,) f32 -> SMEM scalar prefetch

    # Put the SMALLER operand on the inner (fastest) grid axis: the inner
    # operand is the one re-streamed once per outer step.
    if M <= N:
        grid = (Np // tn, Mp // tm)
        xi = lambda i, j, p: (i, 0)
        zi = lambda i, j, p: (0, j)
        oi = lambda i, j, p: (i, j)
    else:
        grid = (Mp // tm, Np // tn)
        xi = lambda j, i, p: (i, 0)
        zi = lambda j, i, p: (0, j)
        oi = lambda j, i, p: (i, j)

    cost = pl.CostEstimate(
        flops=int(2 * Np * Mp * D),
        transcendentals=int(Np * Mp),
        bytes_accessed=int((Np + Mp) * D * in_itemsize + (Np + Mp) * 4
                           + Np * Mp * out_itemsize))

    kern = pl.pallas_call(
        _rbf_kernel,
        out_shape=jax.ShapeDtypeStruct((Np, Mp), out_dtype),
        grid_spec=pltpu.PrefetchScalarGridSpec(
            num_scalar_prefetch=1,                    # params -> SMEM
            grid=grid,
            in_specs=[
                pl.BlockSpec((tn, D), xi),            # X tile
                pl.BlockSpec((D, tm), zi),            # Z^T tile
                pl.BlockSpec((tn, 1), xi),            # -0.5*||x||^2/l^2
                pl.BlockSpec((1, tm), zi),            # -0.5*||z||^2/l^2
            ],
            out_specs=pl.BlockSpec((tn, tm), oi),
        ),
        compiler_params=pltpu.CompilerParams(
            dimension_semantics=("parallel", "parallel"),
            vmem_limit_bytes=vmem_limit),
        cost_estimate=cost,
    )
    K = kern(params, Xf, Zt, X2, Z2)
    if Np != N or Mp != M:
        K = K[:N, :M]
    return K


if __name__ == "__main__":
    key = jax.random.PRNGKey(0)
    kx, kz = jax.random.split(key)

    # Deterministic parameters, matching the module defaults.
    sigma, lengthscale = 1.0, 2.0

    N, M, D = 256, 128, 32
    X = jax.random.normal(kx, (N, D), dtype=jnp.float32)
    Z = jax.random.normal(kz, (M, D), dtype=jnp.float32)

    # Reference (matches torch vmap + transpose semantics): K[n, m] = cov(X[n], Z[m])
    diff = X[:, None, :] - Z[None, :, :]
    ref = (sigma ** 2) * jnp.exp(-0.5 * jnp.sum(diff * diff, -1) / (lengthscale ** 2))

    K = jax.block_until_ready(batched_rbf_forward(X, Z, sigma, lengthscale))
    assert K.shape == (N, M)
    assert jnp.allclose(K, ref, atol=1e-5, rtol=1e-5)

    # Non-tile-aligned shapes (padding path), M < N ordering.
    Ko = jax.block_until_ready(
        batched_rbf_forward(X[:200], Z[:100], sigma, lengthscale))
    assert Ko.shape == (200, 100)
    assert jnp.allclose(Ko, ref[:200, :100], atol=1e-5, rtol=1e-5)

    # M > N exercises the swapped grid ordering (smaller operand re-streamed)
    # and the >=2-program split.
    Ks = jax.block_until_ready(
        batched_rbf_forward(X[:96], Z, sigma, lengthscale))
    assert Ks.shape == (96, M)
    assert jnp.allclose(Ks, ref[:96, :], atol=1e-5, rtol=1e-5)

    # bfloat16 output fast path (halves the dominant HBM output stream).
    Kb = jax.block_until_ready(
        batched_rbf_forward(X, Z, sigma, lengthscale, out_dtype=jnp.bfloat16))
    assert Kb.dtype == jnp.bfloat16
    assert jnp.allclose(Kb.astype(jnp.float32), ref, atol=2e-2, rtol=2e-2)

    # diag=True path (plain-JAX broadcast of sigma^2)
    Kd = jax.block_until_ready(
        batched_rbf_forward(X, Z, sigma, lengthscale, diag=True))
    assert Kd.shape == (1,) + X.shape

    print("KERNEL_OK")
</pallas_src>

<mosaic_0001>
module attributes {stable_mosaic.version = 11 : i64} {
  func.func @_rbf_kernel(%arg0: i32, %arg1: i32, %arg2: memref<2xf32, #tpu.memory_space<smem>>, %arg3: memref<128x32xf32, #tpu.memory_space<vmem>>, %arg4: memref<32x128xf32, #tpu.memory_space<vmem>>, %arg5: memref<128x1xf32, #tpu.memory_space<vmem>>, %arg6: memref<1x128xf32, #tpu.memory_space<vmem>>, %arg7: memref<128x128xf32, #tpu.memory_space<vmem>>) attributes {dimension_semantics = [#tpu.dimension_semantics<parallel>, #tpu.dimension_semantics<parallel>], iteration_bounds = array<i64: 2, 1>, scalar_prefetch = 1 : i64, scratch_operands = 0 : i64, tpu.core_type = #tpu.core_type<tc>, window_params = [{transform_indices = @transform_0, window_bounds = array<i64: 128, 32>}, {transform_indices = @transform_1, window_bounds = array<i64: 32, 128>}, {transform_indices = @transform_2, window_bounds = array<i64: 128, 1>}, {transform_indices = @transform_3, window_bounds = array<i64: 1, 128>}, {transform_indices = @transform_4, window_bounds = array<i64: 128, 128>}]} {
    %c0 = arith.constant 0 : index
    %0 = memref.load %arg2[%c0] : memref<2xf32, #tpu.memory_space<smem>>
    %c1 = arith.constant 1 : index
    %1 = memref.load %arg2[%c1] : memref<2xf32, #tpu.memory_space<smem>>
    %c0_0 = arith.constant 0 : index
    %c0_1 = arith.constant 0 : index
    %2 = vector.load %arg3[%c0_0, %c0_1] : memref<128x32xf32, #tpu.memory_space<vmem>>, vector<128x32xf32>
    %c0_2 = arith.constant 0 : index
    %c0_3 = arith.constant 0 : index
    %3 = vector.load %arg4[%c0_2, %c0_3] : memref<32x128xf32, #tpu.memory_space<vmem>>, vector<32x128xf32>
    %cst = arith.constant dense<0.000000e+00> : vector<128x128xf32>
    %4 = tpu.matmul %2, %3, %cst {dimension_numbers = #tpu.dot_dimension_numbers<[1], [0], [0], [1], [0, 0, 1, 1], [], []>} : vector<128x32xf32>, vector<32x128xf32>, vector<128x128xf32> -> vector<128x128xf32>
    %5 = vector.broadcast %1 : f32 to vector<128x128xf32>
    %6 = arith.mulf %5, %4 : vector<128x128xf32>
    %c0_4 = arith.constant 0 : index
    %c0_5 = arith.constant 0 : index
    %7 = vector.load %arg5[%c0_4, %c0_5] : memref<128x1xf32, #tpu.memory_space<vmem>>, vector<128x1xf32>
    %8 = vector.broadcast %7 : vector<128x1xf32> to vector<128x128xf32>
    %9 = arith.addf %6, %8 : vector<128x128xf32>
    %c0_6 = arith.constant 0 : index
    %c0_7 = arith.constant 0 : index
    %10 = vector.load %arg6[%c0_6, %c0_7] : memref<1x128xf32, #tpu.memory_space<vmem>>, vector<1x128xf32>
    %11 = vector.broadcast %10 : vector<1x128xf32> to vector<128x128xf32>
    %12 = arith.addf %9, %11 : vector<128x128xf32>
    %cst_8 = arith.constant 0.000000e+00 : f32
    %13 = vector.broadcast %cst_8 : f32 to vector<128x128xf32>
    %14 = arith.minimumf %12, %13 : vector<128x128xf32>
    %15 = math.exp %14 : vector<128x128xf32>
    %16 = vector.broadcast %0 : f32 to vector<128x128xf32>
    %17 = arith.mulf %16, %15 : vector<128x128xf32>
    %c0_9 = arith.constant 0 : index
    %c0_10 = arith.constant 0 : index
    %18 = vector.load %arg7[%c0_9, %c0_10] : memref<128x128xf32, #tpu.memory_space<vmem>>, vector<128x128xf32>
    tpu.vector_store %arg7[%c0_9, %c0_10], %17 {strides = array<i32>} : memref<128x128xf32, #tpu.memory_space<vmem>>, vector<128x128xf32>,
    return
  }
  func.func @transform_0(%arg0: i32, %arg1: i32, %arg2: memref<2xf32, #tpu.memory_space<smem>>) -> (i32, i32) {
    %c0_i32 = arith.constant 0 : i32
    %c0_i32_0 = arith.constant 0 : i32
    return %arg0, %c0_i32 : i32, i32
  }
  func.func @transform_1(%arg0: i32, %arg1: i32, %arg2: memref<2xf32, #tpu.memory_space<smem>>) -> (i32, i32) {
    %c0_i32 = arith.constant 0 : i32
    %c0_i32_0 = arith.constant 0 : i32
    return %c0_i32, %arg1 : i32, i32
  }
  func.func @transform_2(%arg0: i32, %arg1: i32, %arg2: memref<2xf32, #tpu.memory_space<smem>>) -> (i32, i32) {
    %c0_i32 = arith.constant 0 : i32
    %c0_i32_0 = arith.constant 0 : i32
    return %arg0, %c0_i32 : i32, i32
  }
  func.func @transform_3(%arg0: i32, %arg1: i32, %arg2: memref<2xf32, #tpu.memory_space<smem>>) -> (i32, i32) {
    %c0_i32 = arith.constant 0 : i32
    %c0_i32_0 = arith.constant 0 : i32
    return %c0_i32, %arg1 : i32, i32
  }
  func.func @transform_4(%arg0: i32, %arg1: i32, %arg2: memref<2xf32, #tpu.memory_space<smem>>) -> (i32, i32) {
    %c0_i32 = arith.constant 0 : i32
    return %arg0, %arg1 : i32, i32
  }
}

</mosaic_0001>

<bundles_post_ra>
// kernel: tpu_custom_call.1
= control target key start
LH: loop header
LB: loop body
LE: loop exit
PB: predicated region body
PF: predicated region fallthrough
CT: control target
= control target key end

     0   :  { %s1446_s0 = inlined_call_operand.vmem [shape: f32[2], index: 0, kind: input, shape index: {}]   ;;  %s1447_s1 = inlined_call_operand.vmem [shape: f32[256,32], index: 1, kind: input, shape index: {}]   ;;  %s1448_s2 = inlined_call_operand.vmem [shape: f32[32,128], index: 2, kind: input, shape index: {}]   ;;  %s1449_s3 = inlined_call_operand.vmem [shape: f32[256,1], index: 3, kind: input, shape index: {}]   ;;  %s1450_s4 = inlined_call_operand.vmem [shape: f32[1,128], index: 4, kind: input, shape index: {}]   ;;  %s1451_s5 = inlined_call_operand.hbm [shape: f32[256,128], index: 5, kind: output, shape index: {}]  }
   0x1   :  { %s10_s20 = sshll.u32 %s1446_s0, 4  ;;  %s11_s20 = int_to_ptr.vmem [resolvable:$true] %s10_s20 }
   0x2   :  { %s1041_s21 = scalar_lea.vmem %s11_s20, 16  ;;  %p1046_p1 = scmp.lt.s32.totalorder %s11_s20, %s11_s20 }
   0x3   :  { %p1042_p0 = scmp.ne.s32.totalorder %s11_s20, %s1041_s21  ;;  %p1047_p2 = scmp.lt.s32.totalorder %s1041_s21, %s1041_s21 }
   0x5   :  { %p1048_p3 = por %p1047_p2, %p1046_p1 }
   0x7   :  { %p1049_p4 = pnand %p1048_p3, %p1042_p0 }
   0x9   :  { %1052 = shalt.err (!%p1049_p4)  }
   0xa   :  { %s1135_s22 = smov [#allocation3]  }
   0xb   :  { %13 = dma.vmem_to_smem %s11_s20, 16, %s1135_s22, [#allocation2] }
   0xc   :  { %1105 = dma.done.wait [#allocation2], 16 }
   0xd   :  { %1106 = vsyncadd [#allocation2], 4294967280 }
   0xe   :  { %15 = sfence }
   0xf   :  { %16 = vsyncpa [#allocation5], 0 }
  0x10   :  { %18 = vsyncpa [#allocation5 + $0x1], 0  ;;  %s1173_s23 = smov 0   ;;  %s1175_s24 = smov 0  }
  0x11   :  { %s1177_s0 = smov 0   ;;  %s1179_s25 = smov 0  }
  0x12   :  { %s1181_s26 = smov 0   ;;  %s1183_s27 = smov 0  }
  0x13 LB: > { %s848_s28 = sadd.s32 4294967295, %s1133_s27   ;;  %s849_s29 = sadd.s32 4294967294, %s1133_s27   ;;  %s1133_s27 = sphi %s1183_s27, %s24_s27   ;;  %s1129_s26 = sphi %s1181_s26, %s1458_s26   ;;  %s1125_s25 = sphi %s1179_s25, %s1457_s25   ;;  %s1121_s0 = sphi %s1177_s0, %s1456_s0   ;;  %s1117_s24 = sphi %s1175_s24, %s1455_s24   ;;  %s1113_s23 = sphi %s1173_s23, %s1454_s23  }
  0x14   : > { %s36_s30 = sadd.s32 1, %s1129_s26  ;;  %s149_s6 = sadd.s32 1, %s1121_s0 }
  0x15   : > { %p38_p5 = scmp.ge.s32.totalorder %s36_s30, 2  ;;  %p159_p6 = scmp.ne.s32.totalorder %s1121_s0, %s1117_s24 }
  0x16   : > { %p160_p7 = scmp.eq.s32.totalorder %s848_s28, 1  ;;  %p165_p8 = scmp.ne.s32.totalorder %s1117_s24, %s1113_s23 }
  0x17   : > { %s1460_s30 = smov (%p38_p5, %s36_s30), 0  ;;  %p166_p10 = scmp.eq.s32.totalorder %s849_s29, 1 }
  0x18   : > { %p1213_p9 = por %p160_p7, %p159_p6  ;;  %s144_s8 = ssub.s32 %s1129_s26, %s1460_s30 }
  0x19   : > { %p854_p11 = scmp.ge.s32.totalorder %s1133_s27, 1  ;;  %p147_p12 = scmp.eq.s32.totalorder %s144_s8, 0 }
  0x1a   : > { %p1220_p13 = por %p166_p10, %p165_p8  ;;  %p215_p0 = scmp.lt.s32.totalorder %s1133_s27, 3 }
  0x1b   : > { %s1226_s10 = scalar_select %p147_p12, %s1121_s0, %s149_s6  }
  0x1c   : > { %p216_p1 = pnand %p854_p11, %p215_p0 }
  0x1d   : > { %v291_v0 = vld [vmem:[%s1448_s2] sm:$0xff] (!%p216_p1)  ;;  %v292_v1 = vld [vmem:[%s1448_s2 + $0x8] sm:$0xff] (!%p216_p1)  ;;  %v293_v2 = vld [vmem:[%s1448_s2 + $0x10] sm:$0xff] (!%p216_p1)  ;;  %s856_s17 = sshll.u32 (!%p216_p1), %s1125_s25, 4  ;;  %v1136_v5 = vmov (!%p216_p1), 0   ;;  %vm295_vm0 = vcmask (!%p216_p1), 261120  }
  0x1e   : > { %219 = sbr.rel (%p216_p1) target bundleno = 314 (0x13a), region = 36  ;;  %v936_v3 = vpack.c.bf16 (!%p216_p1), %v292_v1, %v291_v0  ;;  %v294_v4 = vld [vmem:[%s1448_s2 + $0x18] sm:$0xff] (!%p216_p1)  ;;  %p254_p2 = scmp.lt.s32.totalorder (!%p216_p1), %s856_s17, 31  ;;  %1008 = vset.pattern.permute.xlu1 (!%p216_p1), %v1136_v5  ;;  %1007 = vset.pattern.permute.xlu0 (!%p216_p1), %v1136_v5  ;;  %v1314_v56 = vld [vmem:[%s1450_s4] ss:$0 sm:$0xff] (!%p216_p1) }
  0x1f   : > { %v940_v6 = vpack.c.bf16 (!%p216_p1), %v294_v4, %v293_v2  ;;  %s860_s11 = sld [smem:[#allocation3 + $0x1]] (!%p216_p1)  ;;  %s273_s12 = sld [smem:[#allocation3]] (!%p216_p1) }
  0x20   : > { %937 = vmatprep.subr.bf16.mxu0 (!%p216_p1), %v936_v3  ;;  %944 = vmatprep.subr.bf16.mxu1 (!%p216_p1), %v936_v3  ;;  %s250_s15 = sand.u32 (!%p216_p1), 1, %s1117_s24   ;;  %s883_s18 = sshll.u32 (!%p216_p1), %s1125_s25, 11 }
  0x21   : > { %939 = vmatpush3.bf16.msra.mxu0 (!%p216_p1), %v936_v3  ;;  %946 = vmatpush3.bf16.msra.mxu1 (!%p216_p1), %v936_v3  ;;  %s855_s16 = sshll.u32 (!%p216_p1), %s250_s15, 7  ;;  %s1392_s22 = scalar_lea.hbm (!%p216_p1), %s1451_s5, %s883_s18 }
  0x22   : > { %941 = vmatprep.subr.bf16.mxu0 (!%p216_p1), %v940_v6  ;;  %945 = vmatprep.subr.bf16.mxu1 (!%p216_p1), %v940_v6  ;;  %s1400_s25 = scalar_lea.sflag (!%p216_p1), [#allocation5], %s250_s15  ;;  %s1137_s29 = smov (!%p216_p1), [#allocation4]  }
  0x23   : > { %s1057_s6 = sshll.u32 (!%p216_p1), %s1137_s29, 4  ;;  %s1058_s6 = int_to_ptr.vmem [resolvable:$false] %s1057_s6 }
  0x25   : > { %s1462_s17 = smov (!%p254_p2, %s856_s17), 31  ;;  %943 = vmatpush3.bf16.msra.mxu0 %v940_v6  ;;  %947 = vmatpush3.bf16.msra.mxu1 %v940_v6  ;;  %v1307_v48 = vstv %s860_s11  ;;  %v1318_v62 = vstv %s273_s12 }
  0x26   : > { %s857_s20 = sshll.u32 %s1462_s17, 3  ;;  %s1356_s17 = scalar_lea.vmem [#allocation4], %s855_s16 }
  0x27   : > { %s1244_s28 = scalar_lea.vmem %s1447_s1, %s857_s20  ;;  %s1257_s8 = scalar_lea.vmem %s1449_s3, %s857_s20 }
  0x28   : > { %v275_v7 = vld [vmem:[%s1244_s28] sm:$0xff]  ;;  %v276_v9 = vld [vmem:[%s1244_s28 + $0x8] sm:$0xff]  ;;  %v277_v11 = vld [vmem:[%s1244_s28 + $0x10] sm:$0xff]  ;;  %s737_s19 = sshll.u32 %s1356_s17, 4  ;;  %s1394_s19 = int_to_ptr.vmem [resolvable:$true] %s737_s19 }
  0x29   : > { %v283_v8 = vld [vmem:[%s1244_s28 + $0x40] sm:$0xff]  ;;  %v284_v10 = vld [vmem:[%s1244_s28 + $0x48] sm:$0xff]  ;;  %912 = vmatprep.mubr.msk.f32.mxu0 %vm295_vm0, %v275_v7  ;;  %v285_v12 = vld [vmem:[%s1244_s28 + $0x50] sm:$0xff]  ;;  %p1060_p6 = scmp.lt.s32.totalorder %s1394_s19, %s1058_s6 }
  0x2a   : > { %924 = vmatprep.mubr.msk.f32.mxu1 %vm295_vm0, %v283_v8  ;;  %913 = vmatmul.mubr.msk.f32.vlgmr.msra.gmra.mrb[0].mxu0 %vm295_vm0, %v276_v9  ;;  %v278_v13 = vld [vmem:[%s1244_s28 + $0x18] sm:$0xff]  ;;  %v508_v15 = vld [vmem:[%s1257_s8 + $0x10] sm:$0xff]  ;;  %v506_v16 = vld [vmem:[%s1257_s8] sm:$0xff] }
  0x2b   : > { %925 = vmatmul.mubr.msk.f32.vlgmr.msra.gmra.mrb[0].mxu1 %vm295_vm0, %v284_v10  ;;  %915 = vmatprep.mubr.msk.f32.mxu0 %vm295_vm0, %v277_v11  ;;  %v286_v14 = vld [vmem:[%s1244_s28 + $0x58] sm:$0xff]  ;;  %v279_v17 = vld [vmem:[%s1244_s28 + $0x20] sm:$0xff]  ;;  %v507_v20 = vld [vmem:[%s1257_s8 + $0x8] sm:$0xff] }
  0x2c   : > { %927 = vmatprep.mubr.msk.f32.mxu1 %vm295_vm0, %v285_v12  ;;  %v287_v18 = vld [vmem:[%s1244_s28 + $0x60] sm:$0xff]  ;;  %534 = vperm.xlu1 %1008, %v508_v15   ;;  %v509_v19 = vld [vmem:[%s1257_s8 + $0x18] sm:$0xff]  ;;  %v280_v21 = vld [vmem:[%s1244_s28 + $0x28] sm:$0xff] }
  0x2d   : > { %524 = vperm.xlu0 %1007, %v506_v16   ;;  %v288_v22 = vld [vmem:[%s1244_s28 + $0x68] sm:$0xff]  ;;  %v281_v23 = vld [vmem:[%s1244_s28 + $0x30] sm:$0xff]  ;;  %v510_v26 = vld [vmem:[%s1257_s8 + $0x20] sm:$0xff] }
  0x2e   : > { %916 = vmatmul.mubr.msk.f32.gmra.mrb[2].mxu0 %vm295_vm0, %v278_v13  ;;  %v289_v24 = vld [vmem:[%s1244_s28 + $0x70] sm:$0xff]  ;;  %v511_v25 = vld [vmem:[%s1257_s8 + $0x28] sm:$0xff]  ;;  %v282_v27 = vld [vmem:[%s1244_s28 + $0x38] sm:$0xff] }
  0x2f   : > { %928 = vmatmul.mubr.msk.f32.gmra.mrb[2].mxu1 %vm295_vm0, %v286_v14  ;;  %918 = vmatprep.mubr.msk.f32.mxu0 %vm295_vm0, %v279_v17  ;;  %v290_v28 = vld [vmem:[%s1244_s28 + $0x78] sm:$0xff]  ;;  %v512_v30 = vld [vmem:[%s1257_s8 + $0x30] sm:$0xff]  ;;  %v515_v31 = vld [vmem:[%s1257_s8 + $0x48] sm:$0xff]  ;;  %s1053_s28 = scalar_lea.vmem %s1394_s19, 2048 }
  0x30   : > { %930 = vmatprep.mubr.msk.f32.mxu1 %vm295_vm0, %v287_v18  ;;  %539 = vperm.xlu1 %1008, %v509_v19   ;;  %v513_v29 = vld [vmem:[%s1257_s8 + $0x38] sm:$0xff]  ;;  %v514_v32 = vld [vmem:[%s1257_s8 + $0x40] sm:$0xff]  ;;  %v516_v34 = vld [vmem:[%s1257_s8 + $0x50] sm:$0xff]  ;;  %p1054_p3 = scmp.ne.s32.totalorder %s1394_s19, %s1053_s28 }
  0x31   : > { %529 = vperm.xlu0 %1007, %v507_v20   ;;  %v517_v33 = vld [vmem:[%s1257_s8 + $0x58] sm:$0xff]  ;;  %v519_v35 = vld [vmem:[%s1257_s8 + $0x68] sm:$0xff]  ;;  %v518_v36 = vld [vmem:[%s1257_s8 + $0x60] sm:$0xff] }
  0x32   : > { %919 = vmatmul.mubr.msk.f32.gmra.mrb[4].mxu0 %vm295_vm0, %v280_v21  ;;  %v521_v37 = vld [vmem:[%s1257_s8 + $0x78] sm:$0xff]  ;;  %v520_v38 = vld [vmem:[%s1257_s8 + $0x70] sm:$0xff]  ;;  %p1055_p4 = pnand %p1054_p3, %p1213_p9  ;;  %s1059_s8 = scalar_lea.vmem %s1058_s6, 4096 }
  0x33   : > { %931 = vmatmul.mubr.msk.f32.gmra.mrb[4].mxu1 %vm295_vm0, %v288_v22  ;;  %921 = vmatprep.mubr.msk.f32.mxu0 %vm295_vm0, %v281_v23  ;;  %p1061_p7 = scmp.lt.s32.totalorder %s1059_s8, %s1053_s28 }
  0x34   : > { %933 = vmatprep.mubr.msk.f32.mxu1 %vm295_vm0, %v289_v24  ;;  %549 = vperm.xlu1 %1008, %v511_v25   ;;  %p1056_p5 = pneg %p1055_p4 }
  0x35   : > { %544 = vperm.xlu0 %1007, %v510_v26   ;;  %p1062_p8 = por %p1061_p7, %p1060_p6 }
  0x36   : > { %922 = vmatmul.mubr.msk.f32.gmra.mrb[6].mxu0 %vm295_vm0, %v282_v27 }
  0x37   : > { %934 = vmatmul.mubr.msk.f32.gmra.mrb[6].mxu1 %vm295_vm0, %v290_v28  ;;  %p1063_p10 = pnand %p1062_p8, %p1056_p5 }
  0x38   : > { %559 = vperm.xlu1 %1008, %v513_v29  }
  0x39   : > { %554 = vperm.xlu0 %1007, %v512_v30  }
  0x3c   : > { %569 = vperm.xlu1 %1008, %v515_v31  }
  0x3d   : > { %564 = vperm.xlu0 %1007, %v514_v32  }
  0x40   : > { %579 = vperm.xlu1 %1008, %v517_v33  }
  0x41   : > { %574 = vperm.xlu0 %1007, %v516_v34  }
  0x44   : > { %589 = vperm.xlu1 %1008, %v519_v35  }
  0x45   : > { %584 = vperm.xlu0 %1007, %v518_v36  }
  0x48   : > { %599 = vperm.xlu1 %1008, %v521_v37  }
  0x49   : > { %594 = vperm.xlu0 %1007, %v520_v38  }
  0xab   : > { %v535_v39 = vpop.permute.xlu1 %534 }
  0xac   : > { %v525_v40 = vpop.permute.xlu0 %524 }
  0xaf   : > { %v540_v41 = vpop.permute.xlu1 %539 }
  0xb0   : > { %v530_v42 = vpop.permute.xlu0 %529 }
  0xb3   : > { %v1299_v43 = vpop.permute.xlu1 %549 }
  0xb4   : > { %v1301_v44 = vpop.permute.xlu0 %544 }
  0xb7   : > { %v1303_v45 = vpop.permute.xlu1 %559 }
  0xb8   : > { %v1305_v46 = vpop.permute.xlu0 %554 }
  0xbb   : > { %v570_v47 = vpop.permute.xlu1 %569 }
  0xbc   : > { %v565_v49 = vpop.permute.xlu0 %564 }
  0xbf   : > { %v580_v59 = vpop.permute.xlu1 %579 }
  0xc0   : > { %v575_v13 = vpop.permute.xlu0 %574 }
  0xc3   : > { %v590_v34 = vpop.permute.xlu1 %589 }
  0xfd   : > { %v914_v50 = vpop.f32.mrb[0].mxu0 }
  0xfe   : > { %v926_v51 = vpop.f32.mrb[0].mxu1  ;;  %v491_v52 = vmul.f32 %v914_v50, %v1307_v48  ;;  %v410_v54 = vpop.f32.mrb[1].mxu0 }
  0xff   : > { %v499_v53 = vmul.f32 %v926_v51, %v1307_v48  ;;  %v450_v55 = vpop.f32.mrb[1].mxu1  ;;  %v490_v57 = vmul.f32 %v1307_v48, %v410_v54 }
 0x100   : > { %v498_v58 = vmul.f32 %v1307_v48, %v450_v55  ;;  %v603_v60 = vadd.f32 %v530_v42, %v491_v52 }
 0x101   : > { %v611_v61 = vadd.f32 %v570_v47, %v499_v53  ;;  %v602_v63 = vadd.f32 %v525_v40, %v490_v57  ;;  %v917_v1 = vpop.f32.mrb[2].mxu0 }
 0x102   : > { %v610_v0 = vadd.f32 %v565_v49, %v498_v58  ;;  %v929_v2 = vpop.f32.mrb[2].mxu1  ;;  %v626_v3 = vadd.f32 %v1314_v56, %v603_v60  ;;  %v493_v5 = vmul.f32 %v917_v1, %v1307_v48  ;;  %v420_v7 = vpop.f32.mrb[3].mxu0 }
 0x103   : > { %v634_v4 = vadd.f32 %v1314_v56, %v611_v61  ;;  %v501_v6 = vmul.f32 %v929_v2, %v1307_v48  ;;  %v460_v8 = vpop.f32.mrb[3].mxu1  ;;  %v625_v9 = vadd.f32 %v1314_v56, %v602_v63  ;;  %v492_v11 = vmul.f32 %v1307_v48, %v420_v7  ;;  %v585_v60 = vpop.permute.xlu0 %584 }
 0x104   : > { %v633_v10 = vadd.f32 %v1314_v56, %v610_v0  ;;  %v500_v12 = vmul.f32 %v1307_v48, %v460_v8  ;;  %v642_v14 = vmin.f32 %v626_v3, 0.0  ;;  %v605_v16 = vadd.f32 %v540_v41, %v493_v5  ;;  %v600_v0 = vpop.permute.xlu1 %599 }
 0x105   : > { %v650_v15 = vmin.f32 %v634_v4, 0.0  ;;  %v613_v17 = vadd.f32 %v580_v59, %v501_v6  ;;  %v641_v18 = vmin.f32 %v625_v9, 0.0  ;;  %v604_v20 = vadd.f32 %v535_v39, %v492_v11  ;;  %v920_v22 = vpop.f32.mrb[4].mxu0 }
 0x106   : > { %v649_v19 = vmin.f32 %v633_v10, 0.0  ;;  %v612_v21 = vadd.f32 %v575_v13, %v500_v12  ;;  %v932_v23 = vpop.f32.mrb[4].mxu1  ;;  %v659_v24 = vmul.f32 1.442695, %v642_v14  ;;  %v628_v26 = vadd.f32 %v1314_v56, %v605_v16  ;;  %v430_v28 = vpop.f32.mrb[5].mxu0 }
 0x107   : > { %v675_v25 = vmul.f32 1.442695, %v650_v15  ;;  %v636_v27 = vadd.f32 %v1314_v56, %v613_v17  ;;  %v470_v29 = vpop.f32.mrb[5].mxu1  ;;  %v657_v30 = vmul.f32 1.442695, %v641_v18  ;;  %v627_v32 = vadd.f32 %v1314_v56, %v604_v20 }
 0x108   : > { %v673_v31 = vmul.f32 1.442695, %v649_v19  ;;  %v635_v33 = vadd.f32 %v1314_v56, %v612_v21  ;;  %1009 = vpow2.f32 %v659_v24  ;;  %v644_v35 = vmin.f32 %v628_v26, 0.0 }
 0x109   : > { %v652_v36 = vmin.f32 %v636_v27, 0.0  ;;  %v495_v37 = vmul.f32 %v920_v22, %v1307_v48  ;;  %1011 = vpow2.f32 %v675_v25  ;;  %v643_v38 = vmin.f32 %v627_v32, 0.0  ;;  %v923_v41 = vpop.f32.mrb[6].mxu0  ;;  %v595_v22 = vpop.permute.xlu0 %594 }
 0x10a   : > { %v651_v39 = vmin.f32 %v635_v33, 0.0  ;;  %v503_v40 = vmul.f32 %v932_v23, %v1307_v48  ;;  %v935_v42 = vpop.f32.mrb[6].mxu1  ;;  %1013 = vpow2.f32 %v657_v30  ;;  %v663_v47 = vmul.f32 1.442695, %v644_v35  ;;  %v440_v51 = vpop.f32.mrb[7].mxu0 }
 0x10b   : > { %v679_v49 = vmul.f32 1.442695, %v652_v36  ;;  %v607_v50 = vadd.f32 %v1299_v43, %v495_v37  ;;  %v480_v52 = vpop.f32.mrb[7].mxu1  ;;  %1015 = vpow2.f32 %v673_v31  ;;  %v661_v53 = vmul.f32 1.442695, %v643_v38 }
 0x10c   : > { %v677_v54 = vmul.f32 1.442695, %v651_v39  ;;  %v615_v55 = vadd.f32 %v590_v34, %v503_v40  ;;  %1017 = vpow2.f32 %v663_v47  ;;  %v494_v58 = vmul.f32 %v1307_v48, %v430_v28 }
 0x10d   : > { %v630_v57 = vadd.f32 %v1314_v56, %v607_v50  ;;  %v502_v59 = vmul.f32 %v1307_v48, %v470_v29  ;;  %1019 = vpow2.f32 %v679_v49  ;;  %v497_v43 = vmul.f32 %v923_v41, %v1307_v48 }
 0x10e   : > { %v638_v61 = vadd.f32 %v1314_v56, %v615_v55  ;;  %v505_v63 = vmul.f32 %v935_v42, %v1307_v48  ;;  %1021 = vpow2.f32 %v661_v53  ;;  %v606_v2 = vadd.f32 %v1301_v44, %v494_v58 }
 0x10f   : > { %v646_v1 = vmin.f32 %v630_v57, 0.0  ;;  %v614_v3 = vadd.f32 %v585_v60, %v502_v59  ;;  %1023 = vpow2.f32 %v677_v54  ;;  %v609_v5 = vadd.f32 %v1303_v45, %v497_v43 }
 0x110   : > { %v654_v4 = vmin.f32 %v638_v61, 0.0  ;;  %v617_v6 = vadd.f32 %v600_v0, %v505_v63  ;;  %v629_v8 = vadd.f32 %v1314_v56, %v606_v2  ;;  %v496_v10 = vmul.f32 %v1307_v48, %v440_v51 }
 0x111   : > { %v667_v7 = vmul.f32 1.442695, %v646_v1  ;;  %v637_v9 = vadd.f32 %v1314_v56, %v614_v3  ;;  %v632_v12 = vadd.f32 %v1314_v56, %v609_v5  ;;  %v504_v13 = vmul.f32 %v1307_v48, %v480_v52 }
 0x112   : > { %v683_v11 = vmul.f32 1.442695, %v654_v4  ;;  %v640_v44 = vadd.f32 %v1314_v56, %v617_v6  ;;  %v1010_v14 = vpop.eup %1009  ;;  %v645_v15 = vmin.f32 %v629_v8, 0.0  ;;  %v608_v45 = vadd.f32 %v1305_v46, %v496_v10 }
 0x113   : > { %1025 = vpow2.f32 %v667_v7  ;;  %v653_v16 = vmin.f32 %v637_v9, 0.0  ;;  %v1012_v17 = vpop.eup %1011  ;;  %v691_v18 = vmul.f32 %v1010_v14, %v1318_v62  ;;  %v648_v19 = vmin.f32 %v632_v12, 0.0 }
 0x114   : > { %1027 = vpow2.f32 %v683_v11  ;;  %v656_v20 = vmin.f32 %v640_v44, 0.0  ;;  %v1014_v21 = vpop.eup %1013  ;;  %v699_v23 = vmul.f32 %v1012_v17, %v1318_v62  ;;  %v665_v24 = vmul.f32 1.442695, %v645_v15 }
 0x115   : > { %v681_v25 = vmul.f32 1.442695, %v653_v16  ;;  %v631_v48 = vadd.f32 %v1314_v56, %v608_v45  ;;  %v1016_v26 = vpop.eup %1015  ;;  %707 = vst [vmem:[%s1356_s17 + $0x8] sm:$0xff] %v691_v18  ;;  %v690_v46 = vmul.f32 %v1014_v21, %v1318_v62  ;;  %v671_v27 = vmul.f32 1.442695, %v648_v19 }
 0x116   : > { %v687_v28 = vmul.f32 1.442695, %v656_v20  ;;  %v616_v29 = vadd.f32 %v595_v22, %v504_v13  ;;  %v1018_v30 = vpop.eup %1017  ;;  %715 = vst [vmem:[%s1356_s17 + $0x48] sm:$0xff] %v699_v23  ;;  %v698_v31 = vmul.f32 %v1016_v26, %v1318_v62  ;;  %1029 = vpow2.f32 %v665_v24 }
 0x117   : > { %v647_v32 = vmin.f32 %v631_v48, 0.0  ;;  %v1020_v33 = vpop.eup %1019  ;;  %706 = vst [vmem:[%s1356_s17] sm:$0xff] %v690_v46  ;;  %v693_v34 = vmul.f32 %v1018_v30, %v1318_v62  ;;  %1031 = vpow2.f32 %v681_v25 }
 0x118   : > { %v639_v35 = vadd.f32 %v1314_v56, %v616_v29  ;;  %v1022_v36 = vpop.eup %1021  ;;  %714 = vst [vmem:[%s1356_s17 + $0x40] sm:$0xff] %v698_v31  ;;  %v701_v37 = vmul.f32 %v1020_v33, %v1318_v62  ;;  %1033 = vpow2.f32 %v671_v27 }
 0x119   : > { %v669_v38 = vmul.f32 1.442695, %v647_v32  ;;  %v1024_v39 = vpop.eup %1023  ;;  %709 = vst [vmem:[%s1356_s17 + $0x18] sm:$0xff] %v693_v34  ;;  %v692_v40 = vmul.f32 %v1022_v36, %v1318_v62  ;;  %1035 = vpow2.f32 %v687_v28 }
 0x11a   : > { %v655_v41 = vmin.f32 %v639_v35, 0.0  ;;  %717 = vst [vmem:[%s1356_s17 + $0x58] sm:$0xff] %v701_v37  ;;  %v700_v42 = vmul.f32 %v1024_v39, %v1318_v62 }
 0x11b   : > { %1037 = vpow2.f32 %v669_v38  ;;  %708 = vst [vmem:[%s1356_s17 + $0x10] sm:$0xff] %v692_v40 }
 0x11c   : > { %v685_v56 = vmul.f32 1.442695, %v655_v41  ;;  %716 = vst [vmem:[%s1356_s17 + $0x50] sm:$0xff] %v700_v42 }
 0x11d   : > { %v1026_v47 = vpop.eup %1025 }
 0x11e   : > { %v1028_v49 = vpop.eup %1027  ;;  %v695_v50 = vmul.f32 %v1026_v47, %v1318_v62  ;;  %1039 = vpow2.f32 %v685_v56 }
 0x11f   : > { %v703_v51 = vmul.f32 %v1028_v49, %v1318_v62 }
 0x120   : > { %711 = vst [vmem:[%s1356_s17 + $0x28] sm:$0xff] %v695_v50  ;;  %v1030_v52 = vpop.eup %1029 }
 0x121   : > { %719 = vst [vmem:[%s1356_s17 + $0x68] sm:$0xff] %v703_v51  ;;  %v1032_v53 = vpop.eup %1031  ;;  %v694_v54 = vmul.f32 %v1030_v52, %v1318_v62 }
 0x122   : > { %v1034_v55 = vpop.eup %1033  ;;  %v702_v57 = vmul.f32 %v1032_v53, %v1318_v62 }
 0x123   : > { %v1036_v58 = vpop.eup %1035  ;;  %710 = vst [vmem:[%s1356_s17 + $0x20] sm:$0xff] %v694_v54  ;;  %v697_v59 = vmul.f32 %v1034_v55, %v1318_v62 }
 0x124   : > { %718 = vst [vmem:[%s1356_s17 + $0x60] sm:$0xff] %v702_v57  ;;  %v705_v61 = vmul.f32 %v1036_v58, %v1318_v62 }
 0x125   : > { %v1038_v60 = vpop.eup %1037  ;;  %713 = vst [vmem:[%s1356_s17 + $0x38] sm:$0xff] %v697_v59 }
 0x126   : > { %v696_v43 = vmul.f32 %v1038_v60, %v1318_v62  ;;  %721 = vst [vmem:[%s1356_s17 + $0x78] sm:$0xff] %v705_v61 }
 0x128   : > { %v1040_v63 = vpop.eup %1039  ;;  %712 = vst [vmem:[%s1356_s17 + $0x30] sm:$0xff] %v696_v43 }
 0x129   : > { %v704_v0 = vmul.f32 %v1040_v63, %v1318_v62 }
 0x12b   : > { %720 = vst [vmem:[%s1356_s17 + $0x70] sm:$0xff] %v704_v0 }
 0x12c   : > { %1066 = shalt.err (!%p1063_p10)
}
 0x12d   : > { %s1067_s11 = scalar_lea.hbm %s1392_s22, 2048  ;;  %s1071_s14 = scalar_lea.hbm %s1451_s5, 4096 }
 0x12e   : > { %p1068_p11 = scmp.ne.s32.totalorder %s1392_s22, %s1067_s11  ;;  %p1072_p1 = scmp.lt.u32.totalorder %s1392_s22, %s1451_s5 }
 0x12f   : > { %p1073_p2 = scmp.lt.u32.totalorder %s1071_s14, %s1067_s11  ;;  %p1075_p4 = scmp.lt.u32.totalorder %s1067_s11, %s1392_s22 }
 0x130   : > { %p1069_p12 = pnand %p1068_p11, %p1213_p9 }
 0x131   : > { %p1074_p3 = por %p1073_p2, %p1072_p1 }
 0x132   : > { %p1070_p0 = pneg %p1069_p12 }
 0x133   : > { %p1076_p5 = por %p1075_p4, %p1074_p3 }
 0x135   : > { %p1077_p6 = pnand %p1076_p5, %p1070_p0 }
 0x137   : > { %1080 = shalt.err (!%p1077_p6)
}
 0x138   : > { %s1138_s17 = smov 128   ;;  %s1139_s18 = smov 8  }
 0x139   : > { %948 = dma.vmem_to_hbm [thread:$0]  (%p1213_p9), %s1394_s19, 2048, %s1392_s22, %s1400_s25, %s1138_s17, %s1138_s17, %s1139_s18  }
 0x13a PF: > { %p954_p7 = scmp.ge.s32.totalorder %s1133_s27, 2  ;;  %s752_s20 = sand.u32 1, %s1113_s23  }
 0x13b   : > { %s753_s21 = scalar_lea.sflag [#allocation5], %s752_s20 }
 0x13c   : > { %p951_p8 = pnand %p954_p7, %p1220_p13 }
 0x13e   : > { %1108 = dma.done.wait (!%p951_p8), %s753_s21, 2048  }
 0x13f   : > { %1110 = vsyncadd (!%p951_p8), %s753_s21, 4294965248  ;;  %s24_s27 = sadd.s32 1, %s1133_s27   ;;  %s1454_s23 = smov %s1117_s24 }
 0x140   : > { %p21_p10 = scmp.ge.s32.totalorder %s24_s27, 4   ;;  %s1455_s24 = smov %s1121_s0 }
 0x141   : > { %s1456_s0 = smov %s1226_s10  ;;  %s1457_s25 = smov %s1129_s26 }
 0x142   : > { %s1458_s26 = smov %s1460_s30  ;;  %23 = sbr.rel (!%p21_p10) target bundleno = 19 (0x13), region = 80 }
 0x149   :  { %758 = vsyncpa [#allocation5], 1 }
 0x14a   :  { %760 = vsyncpa [#allocation5 + $0x1], 1 }

</bundles_post_ra>
